<compile_context>
chip_gen: v7x
topology: tpu7x:2x2x1
jax: 0.10.0
libtpu: 0.0.40
codegen_flags: <defaults>
</compile_context>

<pallas_src>
import jax
import jax.numpy as jnp
import numpy as np
from jax.experimental import pallas as pl
from jax.experimental.pallas import tpu as pltpu

block_size = 8
n_embed = 32
vocab_size = 65            # synthetic vocab (e.g. tiny-shakespeare char set size)
VOCAB_PAD = 128            # lane-dense padded vocab width
NEG_FILL = np.float32(-1e30)


def prepare_params(raw):
    """One-time (param-init) prep: cast to f32, pre-transpose lm_head weight and
    lane-pad the vocab dimension to 128. No per-forward glue ops remain."""
    V, E = raw["emb"].shape
    emb_p = jnp.zeros((VOCAB_PAD, E), jnp.float32).at[:V].set(
        raw["emb"].astype(jnp.float32))
    wt_p = jnp.zeros((E, VOCAB_PAD), jnp.float32).at[:, :V].set(
        raw["w"].T.astype(jnp.float32))
    b_p = jnp.full((1, VOCAB_PAD), NEG_FILL, jnp.float32).at[0, :V].set(
        raw["b"].astype(jnp.float32))
    return {
        "emb": emb_p,                                  # (128, E), zero-padded rows
        "pos": raw["pos"].astype(jnp.float32),         # (block_size, E), raw table
        "wt": wt_p,                                    # (E, 128), zero-padded cols
        "b": b_p,                                      # (1, 128), -1e30 padded cols
        "vocab_size": V,
    }


def _compute_logits(idx, T, emb_ref, pos_ref, wt_ref, b_ref, out_shape):
    """Shared body: one-hot gather (MXU), positional add, lm_head (MXU)."""
    TM, VP = out_shape
    vocab_iota = jax.lax.broadcasted_iota(jnp.int32, (TM, VP), 1)

    # Token embedding gather as one-hot @ table (MXU). f32 operands are fine at
    # this size; a scaled-up v6e/v7x variant would cast the dot operands to
    # bf16 while keeping preferred_element_type=f32.
    onehot = (idx == vocab_iota).astype(jnp.float32)                # (TM, 128)
    tok = jnp.dot(onehot, emb_ref[...],
                  preferred_element_type=jnp.float32)               # (TM, E)

    # Positional add done in-kernel: tile the (T, E) table over the TM rows
    # (wrapper guarantees TM % T == 0, so tile boundaries align with T). Doing
    # the add pre-lm_head keeps it at E=32 lanes instead of 128.
    pos = jnp.tile(pos_ref[0:T, :], (TM // T, 1))                   # (TM, E)
    x = tok + pos

    # lm_head: wt is pre-transposed (E, 128); padded bias columns are -1e30 so
    # padded logits act like -inf. Output is lane-dense (128 wide).
    logits = jnp.dot(x, wt_ref[...],
                     preferred_element_type=jnp.float32) + b_ref[...]
    return logits, vocab_iota


def _make_loss_kernel(T: int, n_rows: int):
    """Training-path kernel: logits + cross-entropy loss (mean over B*T)."""
    inv_n = np.float32(1.0 / n_rows)

    def kernel(idx_ref, tgt_ref, emb_ref, pos_ref, wt_ref, b_ref,
               logits_ref, loss_ref, loss_acc):
        step = pl.program_id(0)

        @pl.when(step == 0)
        def _():
            loss_acc[0, 0] = jnp.float32(0.0)

        idx = idx_ref[...]                              # (TM, 1) int32
        tgt = tgt_ref[...]                              # (TM, 1) int32
        logits, vocab_iota = _compute_logits(
            idx, T, emb_ref, pos_ref, wt_ref, b_ref, logits_ref.shape)
        logits_ref[...] = logits

        # Cross-entropy partial sum for this row tile (online over row tiles).
        m = jnp.max(logits, axis=-1, keepdims=True)                 # (TM, 1)
        lse = m + jnp.log(jnp.sum(jnp.exp(logits - m), axis=-1, keepdims=True))
        # TODO(synk): replace compare+select+lane-reduce with a true lane gather
        # (take_along_axis) once that lowers reliably in Mosaic.
        correct = jnp.sum(jnp.where(tgt == vocab_iota, logits, 0.0),
                          axis=-1, keepdims=True)                   # (TM, 1)
        loss_acc[0, 0] += jnp.sum(lse - correct)

        @pl.when(step == pl.num_programs(0) - 1)
        def _():
            loss_ref[0, 0] = loss_acc[0, 0] * inv_n

    return kernel


def _make_infer_kernel(T: int):
    """Inference-path kernel (targets=None): logits only, no exp/log/select."""

    def kernel(idx_ref, emb_ref, pos_ref, wt_ref, b_ref, logits_ref):
        logits, _ = _compute_logits(
            idx_ref[...], T, emb_ref, pos_ref, wt_ref, b_ref, logits_ref.shape)
        logits_ref[...] = logits

    return kernel


def _choose_row_tile(N: int, T: int) -> int:
    """Single block while everything fits comfortably; cap to bound VMEM (and
    enable pipelining of idx/logits tiles against the matmuls) as B*T grows."""
    if N <= 512:
        return N                       # single tile: block == full array, no
                                       # (8,128) divisibility constraints apply
    TM = 512
    assert N % TM == 0 and TM % T == 0, (
        f"B*T={N} must be a multiple of {TM} (and {TM} of T={T}) "
        "for the tiled path")
    return TM


def bigram_forward(kparams, idx, targets=None):
    B, T = idx.shape
    N = B * T
    V = kparams["vocab_size"]
    E = kparams["emb"].shape[1]
    VP = kparams["wt"].shape[1]

    TM = _choose_row_tile(N, T)
    n_tiles = N // TM

    idx2 = idx.reshape(N, 1).astype(jnp.int32)

    # Resident (constant block-index) parameter specs shared by both paths.
    param_specs = [
        pl.BlockSpec((VP, E), lambda i: (0, 0)),                 # emb (resident)
        pl.BlockSpec(kparams["pos"].shape, lambda i: (0, 0)),    # pos (resident)
        pl.BlockSpec((E, VP), lambda i: (0, 0)),                 # wt  (resident)
        pl.BlockSpec((1, VP), lambda i: (0, 0)),                 # bias (resident)
    ]
    row_spec = pl.BlockSpec((TM, 1), lambda i: (i, 0))
    logits_spec = pl.BlockSpec((TM, VP), lambda i: (i, 0))       # lane-dense out

    matmul_flops = 2 * N * VP * E + 2 * N * E * VP               # two matmuls
    param_bytes = 4 * (VP * E + kparams["pos"].size + E * VP + VP)

    if targets is None:
        grid_spec = pltpu.PrefetchScalarGridSpec(
            num_scalar_prefetch=0,
            grid=(n_tiles,),
            in_specs=[row_spec] + param_specs,
            out_specs=logits_spec,
        )
        cost = pl.CostEstimate(
            flops=matmul_flops,
            transcendentals=0,
            bytes_accessed=4 * (N + N * VP) + param_bytes,
        )
        logits_pad = pl.pallas_call(
            _make_infer_kernel(T),
            grid_spec=grid_spec,
            out_shape=jax.ShapeDtypeStruct((N, VP), jnp.float32),
            compiler_params=pltpu.CompilerParams(
                # no cross-tile state -> row tiles can shard across cores
                dimension_semantics=("parallel",)),
            cost_estimate=cost,
        )(idx2, kparams["emb"], kparams["pos"], kparams["wt"], kparams["b"])
        # mirror torch: targets=None returns (B, T, C) logits and no loss
        return logits_pad[:, :V].reshape(B, T, V), None

    tgt2 = targets.reshape(N, 1).astype(jnp.int32)

    grid_spec = pltpu.PrefetchScalarGridSpec(
        num_scalar_prefetch=0,
        grid=(n_tiles,),
        in_specs=[row_spec, row_spec] + param_specs,
        out_specs=(
            logits_spec,                                         # lane-dense logits
            pl.BlockSpec(memory_space=pltpu.MemorySpace.SMEM),   # (1,1) scalar loss
        ),
        scratch_shapes=[pltpu.SMEM((1, 1), jnp.float32)],        # loss accumulator
    )
    cost = pl.CostEstimate(
        flops=matmul_flops,
        transcendentals=N * VP + N,                              # exp + log
        bytes_accessed=4 * (2 * N + N * VP + 1) + param_bytes,
    )

    logits_pad, loss = pl.pallas_call(
        _make_loss_kernel(T, N),
        grid_spec=grid_spec,
        out_shape=(jax.ShapeDtypeStruct((N, VP), jnp.float32),
                   jax.ShapeDtypeStruct((1, 1), jnp.float32)),
        compiler_params=pltpu.CompilerParams(
            # loss accumulates across row tiles -> reduction axis; per-core
            # partial losses would be needed to mark this "parallel" on v7x.
            dimension_semantics=("arbitrary",)),
        cost_estimate=cost,
    )(idx2, tgt2, kparams["emb"], kparams["pos"], kparams["wt"], kparams["b"])

    # mirror torch: when targets are given, logits come back as (B*T, C)
    return logits_pad[:, :V], loss[0, 0]


def reference_forward(params, idx, targets):
    B, T = idx.shape
    tok = params["emb"][idx]                     # (B, T, E)
    pos = params["pos"][:T]                      # (T, E)
    x = tok + pos[None, :, :]
    logits = x @ params["w"].T + params["b"]     # (B, T, V)
    lf = logits.reshape(B * T, -1)
    tf = targets.reshape(B * T)
    lse = jax.scipy.special.logsumexp(lf, axis=-1)
    loss = jnp.mean(lse - lf[jnp.arange(B * T), tf])
    return lf, loss


if __name__ == "__main__":
    B, T = 2, block_size
    key = jax.random.PRNGKey(0)
    k1, k2, k3, k4, k5, k6 = jax.random.split(key, 6)

    # deterministic parameter init (matches shapes of the nn.Module)
    bound = 1.0 / np.sqrt(n_embed)
    params = {
        "emb": jax.random.normal(k1, (vocab_size, n_embed), jnp.float32),
        "pos": jax.random.normal(k2, (block_size, n_embed), jnp.float32),
        "w": jax.random.uniform(k3, (vocab_size, n_embed), jnp.float32,
                                -bound, bound),
        "b": jax.random.uniform(k4, (vocab_size,), jnp.float32, -bound, bound),
    }
    # one-time kernel-layout prep (transpose / pad / cast) — not per forward
    kparams = prepare_params(params)

    idx = jax.random.randint(k5, (B, T), 0, vocab_size, jnp.int32)
    targets = jax.random.randint(k6, (B, T), 0, vocab_size, jnp.int32)

    # training path (logits + loss)
    logits, loss = bigram_forward(kparams, idx, targets)
    jax.block_until_ready((logits, loss))

    ref_logits, ref_loss = reference_forward(params, idx, targets)
    np.testing.assert_allclose(np.asarray(logits), np.asarray(ref_logits),
                               rtol=1e-5, atol=1e-5)
    np.testing.assert_allclose(np.asarray(loss), np.asarray(ref_loss),
                               rtol=1e-5, atol=1e-5)

    # inference path (targets=None -> (B, T, C) logits, no loss, no CE work)
    logits_inf, loss_none = bigram_forward(kparams, idx, None)
    jax.block_until_ready(logits_inf)
    assert loss_none is None
    np.testing.assert_allclose(
        np.asarray(logits_inf.reshape(B * T, vocab_size)),
        np.asarray(ref_logits), rtol=1e-5, atol=1e-5)

    print("KERNEL_OK")
</pallas_src>

<mosaic_0001>
module attributes {stable_mosaic.version = 11 : i64} {
  func.func @kernel(%arg0: i32, %arg1: memref<16x1xi32, #tpu.memory_space<vmem>>, %arg2: memref<16x1xi32, #tpu.memory_space<vmem>>, %arg3: memref<128x32xf32, #tpu.memory_space<vmem>>, %arg4: memref<8x32xf32, #tpu.memory_space<vmem>>, %arg5: memref<32x128xf32, #tpu.memory_space<vmem>>, %arg6: memref<1x128xf32, #tpu.memory_space<vmem>>, %arg7: memref<16x128xf32, #tpu.memory_space<vmem>>, %arg8: memref<1x1xf32, #tpu.memory_space<smem>>, %arg9: memref<1x1xf32, #tpu.memory_space<smem>>) attributes {dimension_semantics = [#tpu.dimension_semantics<arbitrary>], iteration_bounds = array<i64: 1>, scalar_prefetch = 0 : i64, scratch_operands = 1 : i64, tpu.core_type = #tpu.core_type<tc>, window_params = [{transform_indices = @transform_0, window_bounds = array<i64: 16, 1>}, {transform_indices = @transform_1, window_bounds = array<i64: 16, 1>}, {pipeline_mode = #tpu.pipeline_mode<synchronous>, transform_indices = @transform_2, window_bounds = array<i64: 128, 32>}, {pipeline_mode = #tpu.pipeline_mode<synchronous>, transform_indices = @transform_3, window_bounds = array<i64: 8, 32>}, {pipeline_mode = #tpu.pipeline_mode<synchronous>, transform_indices = @transform_4, window_bounds = array<i64: 32, 128>}, {pipeline_mode = #tpu.pipeline_mode<synchronous>, transform_indices = @transform_5, window_bounds = array<i64: 1, 128>}, {transform_indices = @transform_6, window_bounds = array<i64: 16, 128>}, {transform_indices = @transform_7, window_bounds = array<i64: 1, 1>}]} {
    %c0_i32 = arith.constant 0 : i32
    %0 = arith.cmpi eq, %arg0, %c0_i32 : i32
    %1 = arith.extui %0 : i1 to i32
    %c0_i32_0 = arith.constant 0 : i32
    %2 = arith.cmpi ne, %1, %c0_i32_0 : i32
    scf.if %2 {
      %cst_26 = arith.constant 0.000000e+00 : f32
      %c0_27 = arith.constant 0 : index
      %c0_28 = arith.constant 0 : index
      %47 = memref.load %arg9[%c0_27, %c0_28] : memref<1x1xf32, #tpu.memory_space<smem>>
      memref.store %cst_26, %arg9[%c0_27, %c0_28] : memref<1x1xf32, #tpu.memory_space<smem>>
    } else {
    }
    %c0 = arith.constant 0 : index
    %c0_1 = arith.constant 0 : index
    %3 = vector.load %arg1[%c0, %c0_1] : memref<16x1xi32, #tpu.memory_space<vmem>>, vector<16x1xi32>
    %c0_2 = arith.constant 0 : index
    %c0_3 = arith.constant 0 : index
    %4 = vector.load %arg2[%c0_2, %c0_3] : memref<16x1xi32, #tpu.memory_space<vmem>>, vector<16x1xi32>
    %5 = tpu.iota {dimensions = array<i32: 1>} : vector<16x128xi32>
    %6 = vector.broadcast %3 : vector<16x1xi32> to vector<16x128xi32>
    %7 = arith.cmpi eq, %6, %5 : vector<16x128xi32>
    %8 = arith.extui %7 : vector<16x128xi1> to vector<16x128xi32>
    %9 = arith.sitofp %8 : vector<16x128xi32> to vector<16x128xf32>
    %c0_4 = arith.constant 0 : index
    %c0_5 = arith.constant 0 : index
    %10 = vector.load %arg3[%c0_4, %c0_5] : memref<128x32xf32, #tpu.memory_space<vmem>>, vector<128x32xf32>
    %cst = arith.constant dense<0.000000e+00> : vector<16x32xf32>
    %11 = tpu.matmul %9, %10, %cst {dimension_numbers = #tpu.dot_dimension_numbers<[1], [0], [0], [1], [0, 0, 1, 1], [], []>} : vector<16x128xf32>, vector<128x32xf32>, vector<16x32xf32> -> vector<16x32xf32>
    %c0_6 = arith.constant 0 : index
    %c0_7 = arith.constant 0 : index
    %12 = vector.load %arg4[%c0_6, %c0_7] : memref<8x32xf32, #tpu.memory_space<vmem>>, vector<8x32xf32>
    %13 = tpu.concatenate %12, %12 in 0 : vector<8x32xf32>, vector<8x32xf32> -> vector<16x32xf32>
    %14 = arith.addf %11, %13 : vector<16x32xf32>
    %c0_8 = arith.constant 0 : index
    %c0_9 = arith.constant 0 : index
    %15 = vector.load %arg5[%c0_8, %c0_9] : memref<32x128xf32, #tpu.memory_space<vmem>>, vector<32x128xf32>
    %cst_10 = arith.constant dense<0.000000e+00> : vector<16x128xf32>
    %16 = tpu.matmul %14, %15, %cst_10 {dimension_numbers = #tpu.dot_dimension_numbers<[1], [0], [0], [1], [0, 0, 1, 1], [], []>} : vector<16x32xf32>, vector<32x128xf32>, vector<16x128xf32> -> vector<16x128xf32>
    %c0_11 = arith.constant 0 : index
    %c0_12 = arith.constant 0 : index
    %17 = vector.load %arg6[%c0_11, %c0_12] : memref<1x128xf32, #tpu.memory_space<vmem>>, vector<1x128xf32>
    %18 = vector.broadcast %17 : vector<1x128xf32> to vector<16x128xf32>
    %19 = arith.addf %16, %18 : vector<16x128xf32>
    %c0_13 = arith.constant 0 : index
    %c0_14 = arith.constant 0 : index
    %20 = vector.load %arg7[%c0_13, %c0_14] : memref<16x128xf32, #tpu.memory_space<vmem>>, vector<16x128xf32>
    tpu.vector_store %arg7[%c0_13, %c0_14], %19 {strides = array<i32>} : memref<16x128xf32, #tpu.memory_space<vmem>>, vector<16x128xf32>,
    %cst_15 = arith.constant dense<0xFF800000> : vector<16xf32>
    %21 = vector.multi_reduction <maximumf>, %19, %cst_15 [1] : vector<16x128xf32> to vector<16xf32>
    %22 = vector.shape_cast %21 : vector<16xf32> to vector<16x1xf32>
    %23 = vector.broadcast %22 : vector<16x1xf32> to vector<16x128xf32>
    %24 = arith.subf %19, %23 : vector<16x128xf32>
    %25 = math.exp %24 : vector<16x128xf32>
    %cst_16 = arith.constant dense<0.000000e+00> : vector<16xf32>
    %26 = vector.multi_reduction <add>, %25, %cst_16 [1] : vector<16x128xf32> to vector<16xf32>
    %27 = vector.shape_cast %26 : vector<16xf32> to vector<16x1xf32>
    %28 = math.log %27 : vector<16x1xf32>
    %29 = arith.addf %22, %28 : vector<16x1xf32>
    %30 = vector.broadcast %4 : vector<16x1xi32> to vector<16x128xi32>
    %31 = arith.cmpi eq, %30, %5 : vector<16x128xi32>
    %cst_17 = arith.constant 0.000000e+00 : f32
    %32 = vector.broadcast %cst_17 : f32 to vector<16x128xf32>
    %33 = arith.select %31, %19, %32 : vector<16x128xi1>, vector<16x128xf32>
    %cst_18 = arith.constant dense<0.000000e+00> : vector<16xf32>
    %34 = vector.multi_reduction <add>, %33, %cst_18 [1] : vector<16x128xf32> to vector<16xf32>
    %35 = vector.shape_cast %34 : vector<16xf32> to vector<16x1xf32>
    %c0_19 = arith.constant 0 : index
    %c0_20 = arith.constant 0 : index
    %36 = memref.load %arg9[%c0_19, %c0_20] : memref<1x1xf32, #tpu.memory_space<smem>>
    %37 = arith.subf %29, %35 : vector<16x1xf32>
    %38 = vector.shape_cast %37 : vector<16x1xf32> to vector<1x16x1xf32>
    %cst_21 = arith.constant dense<0.000000e+00> : vector<1xf32>
    %39 = vector.multi_reduction <add>, %38, %cst_21 [1, 2] : vector<1x16x1xf32> to vector<1xf32>
    %40 = vector.shape_cast %39 : vector<1xf32> to vector<1x1x1xf32>
    %41 = vector.extract %40[0, 0, 0] : f32 from vector<1x1x1xf32>
    %42 = arith.addf %36, %41 : f32
    %c0_22 = arith.constant 0 : index
    %c0_23 = arith.constant 0 : index
    %43 = memref.load %arg9[%c0_22, %c0_23] : memref<1x1xf32, #tpu.memory_space<smem>>
    memref.store %42, %arg9[%c0_22, %c0_23] : memref<1x1xf32, #tpu.memory_space<smem>>
    %c0_i32_24 = arith.constant 0 : i32
    %44 = arith.cmpi eq, %arg0, %c0_i32_24 : i32
    %45 = arith.extui %44 : i1 to i32
    %c0_i32_25 = arith.constant 0 : i32
    %46 = arith.cmpi ne, %45, %c0_i32_25 : i32
    scf.if %46 {
      %c0_26 = arith.constant 0 : index
      %c0_27 = arith.constant 0 : index
      %47 = memref.load %arg9[%c0_26, %c0_27] : memref<1x1xf32, #tpu.memory_space<smem>>
      %cst_28 = arith.constant 6.250000e-02 : f32
      %48 = arith.mulf %47, %cst_28 : f32
      %c0_29 = arith.constant 0 : index
      %c0_30 = arith.constant 0 : index
      %49 = memref.load %arg8[%c0_29, %c0_30] : memref<1x1xf32, #tpu.memory_space<smem>>
      memref.store %48, %arg8[%c0_29, %c0_30] : memref<1x1xf32, #tpu.memory_space<smem>>
    } else {
    }
    return
  }
  func.func @transform_0(%arg0: i32) -> (i32, i32) {
    %c0_i32 = arith.constant 0 : i32
    %c0_i32_0 = arith.constant 0 : i32
    return %arg0, %c0_i32 : i32, i32
  }
  func.func @transform_1(%arg0: i32) -> (i32, i32) {
    %c0_i32 = arith.constant 0 : i32
    %c0_i32_0 = arith.constant 0 : i32
    return %arg0, %c0_i32 : i32, i32
  }
  func.func @transform_2(%arg0: i32) -> (i32, i32) {
    %c0_i32 = arith.constant 0 : i32
    %c0_i32_0 = arith.constant 0 : i32
    %c0_i32_1 = arith.constant 0 : i32
    return %c0_i32, %c0_i32_0 : i32, i32
  }
  func.func @transform_3(%arg0: i32) -> (i32, i32) {
    %c0_i32 = arith.constant 0 : i32
    %c0_i32_0 = arith.constant 0 : i32
    %c0_i32_1 = arith.constant 0 : i32
    return %c0_i32, %c0_i32_0 : i32, i32
  }
  func.func @transform_4(%arg0: i32) -> (i32, i32) {
    %c0_i32 = arith.constant 0 : i32
    %c0_i32_0 = arith.constant 0 : i32
    %c0_i32_1 = arith.constant 0 : i32
    return %c0_i32, %c0_i32_0 : i32, i32
  }
  func.func @transform_5(%arg0: i32) -> (i32, i32) {
    %c0_i32 = arith.constant 0 : i32
    %c0_i32_0 = arith.constant 0 : i32
    %c0_i32_1 = arith.constant 0 : i32
    return %c0_i32, %c0_i32_0 : i32, i32
  }
  func.func @transform_6(%arg0: i32) -> (i32, i32) {
    %c0_i32 = arith.constant 0 : i32
    %c0_i32_0 = arith.constant 0 : i32
    return %arg0, %c0_i32 : i32, i32
  }
  func.func @transform_7(%arg0: i32) -> (i32, i32) {
    %c0_i32 = arith.constant 0 : i32
    %c0_i32_0 = arith.constant 0 : i32
    %c0_i32_1 = arith.constant 0 : i32
    return %c0_i32, %c0_i32_0 : i32, i32
  }
}

</mosaic_0001>

<bundles_post_ra>
// kernel: tpu_custom_call.1
= control target key start
LH: loop header
LB: loop body
LE: loop exit
PB: predicated region body
PF: predicated region fallthrough
CT: control target
= control target key end

     0   :  { %13 = vsyncpa [#allocation4], 0  ;;  %v498_v1 = vmov 0   ;;  %s646_s0 = inlined_call_operand.vmem [shape: s32[16,1], index: 0, kind: input, shape index: {}]   ;;  %s647_s1 = inlined_call_operand.vmem [shape: s32[16,1], index: 1, kind: input, shape index: {}]   ;;  %s648_s2 = inlined_call_operand.vmem [shape: f32[128,32], index: 2, kind: input, shape index: {}]   ;;  %s649_s3 = inlined_call_operand.vmem [shape: f32[8,32], index: 3, kind: input, shape index: {}]   ;;  %s650_s4 = inlined_call_operand.vmem [shape: f32[32,128], index: 4, kind: input, shape index: {}]   ;;  %s651_s5 = inlined_call_operand.vmem [shape: f32[1,128], index: 5, kind: input, shape index: {}]   ;;  %s652_s6 = inlined_call_operand.hbm [shape: f32[16,128], index: 6, kind: output, shape index: {0}]   ;;  %s653_s7 = inlined_call_operand.hbm [shape: f32[1,1], index: 7, kind: output, shape index: {1}]  }
   0x1   :  { %v33_v0 = vld [vmem:[%s646_s0] sm:$0xff]  ;;  %452 = vset.pattern.permute.xlu0 %v498_v1  ;;  %v52_v3 = vld [vmem:[%s648_s2 + $0x8] sm:$0xff]  ;;  %v53_v4 = vld [vmem:[%s648_s2 + $0x10] sm:$0xff]  ;;  %453 = vset.pattern.permute.xlu1 %v498_v1 }
   0x2   :  { %v51_v2 = vld [vmem:[%s648_s2] sm:$0xff]  ;;  %40 = vperm.xlu0 %452, %v33_v0   ;;  %v54_v6 = vld [vmem:[%s648_s2 + $0x18] sm:$0xff]  ;;  %v34_v7 = vld [vmem:[%s646_s0 + $0x8] sm:$0xff] }
   0x3   :  { %v404_v5 = vpack.c.bf16 %v52_v3, %v51_v2  ;;  %v408_v8 = vpack.c.bf16 %v54_v6, %v53_v4  ;;  %v55_v9 = vld [vmem:[%s648_s2 + $0x20] sm:$0xff]  ;;  %v56_v10 = vld [vmem:[%s648_s2 + $0x28] sm:$0xff] }
   0x4   :  { %v412_v11 = vpack.c.bf16 %v56_v10, %v55_v9 }
   0x5   :  { %405 = vmatprep.subr.bf16.mxu0 %v404_v5 }
   0x6   :  { %407 = vmatpush3.bf16.msra.mxu0 %v404_v5  ;;  %43 = vperm.xlu0 %452, %v34_v7  }
   0x7   :  { %409 = vmatprep.subr.bf16.mxu0 %v408_v8 }
   0x8   :  { %14 = vsyncpa [#allocation5], 0  ;;  %v35_v12 = vld [vmem:[%s647_s1] sm:$0xff]  ;;  %v57_v13 = vld [vmem:[%s648_s2 + $0x30] sm:$0xff]  ;;  %v37_v31 = vlaneseq  ;;  %v499_v34 = vmov 1.0   ;;  %vm154_vm2 = vcmask 261120  }
   0x9   :  { %v58_v14 = vld [vmem:[%s648_s2 + $0x38] sm:$0xff]  ;;  %v143_v16 = vld [vmem:[%s650_s4] sm:$0xff]  ;;  %v144_v17 = vld [vmem:[%s650_s4 + $0x8] sm:$0xff]  ;;  %vm275_vm5 = vcmask 7168  }
   0xa   :  { %411 = vmatpush3.bf16.msra.mxu0 %v408_v8  ;;  %259 = vperm.xlu0 %452, %v35_v12   ;;  %v416_v15 = vpack.c.bf16 %v58_v14, %v57_v13  ;;  %v59_v18 = vld [vmem:[%s648_s2 + $0x40] sm:$0xff]  ;;  %v60_v19 = vld [vmem:[%s648_s2 + $0x48] sm:$0xff]  ;;  %v436_v20 = vpack.c.bf16 %v144_v17, %v143_v16  ;;  %v61_v22 = vld [vmem:[%s648_s2 + $0x50] sm:$0xff]  ;;  %v38_v32 = vand.u32 127, %v37_v31 }
   0xb   :  { %413 = vmatprep.subr.bf16.mxu0 %v412_v11  ;;  %v420_v21 = vpack.c.bf16 %v60_v19, %v59_v18  ;;  %v62_v23 = vld [vmem:[%s648_s2 + $0x58] sm:$0xff]  ;;  %v63_v25 = vld [vmem:[%s648_s2 + $0x60] sm:$0xff]  ;;  %v64_v26 = vld [vmem:[%s648_s2 + $0x68] sm:$0xff] }
   0xc   :  { %437 = vmatprep.subr.bf16.mxu1 %v436_v20  ;;  %v424_v24 = vpack.c.bf16 %v62_v23, %v61_v22  ;;  %v428_v27 = vpack.c.bf16 %v64_v26, %v63_v25  ;;  %v65_v28 = vld [vmem:[%s648_s2 + $0x70] sm:$0xff]  ;;  %v66_v29 = vld [vmem:[%s648_s2 + $0x78] sm:$0xff]  ;;  %v67_v39 = vld [vmem:[%s649_s3] sm:$0xff] }
   0xd   :  { %439 = vmatpush3.bf16.msra.mxu1 %v436_v20  ;;  %v432_v30 = vpack.c.bf16 %v66_v29, %v65_v28  ;;  %v145_v36 = vld [vmem:[%s650_s4 + $0x10] sm:$0xff]  ;;  %v146_v37 = vld [vmem:[%s650_s4 + $0x18] sm:$0xff]  ;;  %v331_v44 = vld [vmem:[%s651_s5] ss:$0 sm:$0xff] }
   0xe   :  { %415 = vmatpush3.bf16.msra.mxu0 %v412_v11  ;;  %v440_v38 = vpack.c.bf16 %v146_v37, %v145_v36  ;;  %v36_v49 = vld [vmem:[%s647_s1 + $0x8] sm:$0xff]  ;;  %s500_s1 = smov [#allocation3]  }
   0xf   :  { %417 = vmatprep.subr.bf16.mxu0 %v416_v15  ;;  %s303_s5 = sshll.u32 %s500_s1, 4  ;;  %s304_s5 = int_to_ptr.vmem [resolvable:$true] %s303_s5 }
  0x10   :  { %441 = vmatprep.subr.bf16.mxu1 %v440_v38  ;;  %s462_s25 = scalar_lea.vmem %s304_s5, 256  ;;  %p467_p1 = scmp.lt.s32.totalorder %s304_s5, %s304_s5 }
  0x11   :  { %443 = vmatpush3.bf16.msra.mxu1 %v440_v38  ;;  %p463_p0 = scmp.ne.s32.totalorder %s304_s5, %s462_s25  ;;  %p468_p2 = scmp.lt.s32.totalorder %s462_s25, %s462_s25 }
  0x12   :  { %419 = vmatpush3.bf16.msra.mxu0 %v416_v15 }
  0x13   :  { %421 = vmatprep.subr.bf16.mxu0 %v420_v21  ;;  %p469_p3 = por %p468_p2, %p467_p1 }
  0x15   :  { %p470_p4 = pnand %p469_p3, %p463_p0 }
  0x16   :  { %423 = vmatpush3.bf16.msra.mxu0 %v420_v21 }
  0x17   :  { %425 = vmatprep.subr.bf16.mxu0 %v424_v24 }
  0x1a   :  { %427 = vmatpush3.bf16.msra.mxu0 %v424_v24 }
  0x1b   :  { %429 = vmatprep.subr.bf16.mxu0 %v428_v27 }
  0x1e   :  { %431 = vmatpush3.bf16.msra.mxu0 %v428_v27 }
  0x1f   :  { %433 = vmatprep.subr.bf16.mxu0 %v432_v30 }
  0x22   :  { %435 = vmatpush3.bf16.msra.mxu0 %v432_v30 }
  0x81   :  { %v41_v33 = vpop.permute.xlu0 %40 }
  0x82   :  { %vm45_vm0 = vcmp.eq.s32.totalorder %v41_v33, %v38_v32 }
  0x83   :  { %390 = vmatprep.mubr.msk.f32.mxu0 %vm45_vm0, %v499_v34 }
  0x85   :  { %v44_v35 = vpop.permute.xlu0 %43 }
  0x86   :  { %vm46_vm1 = vcmp.eq.s32.totalorder %v44_v35, %v38_v32 }
  0x87   :  { %391 = vmatmul.mubr.msk.f32.vlgmr.msra.gmra.mrb[0].mxu0 %vm46_vm1, %v499_v34 }
  0x89   :  { %v260_v58 = vpop.permute.xlu0 %259 }
  0x8a   :  { %vm264_vm3 = vcmp.eq.s32.totalorder %v260_v58, %v38_v32 }
 0x15a   :  { %v392_v40 = vpop.f32.mrb[0].mxu0 }
 0x15b   :  { %v134_v41 = vpop.f32.mrb[1].mxu0  ;;  %v140_v43 = vadd.f32 %v392_v40, %v67_v39 }
 0x15c   :  { %v135_v42 = vadd.f32 %v134_v41, %v67_v39 }
 0x15e   :  { %401 = vmatprep.mubr.msk.f32.mxu1 %vm154_vm2, %v135_v42 }
 0x15f   :  { %402 = vmatmul.mubr.msk.f32.vlgmr.msra.gmra.mrb[0].mxu1 %vm154_vm2, %v140_v43 }
 0x232   :  { %v403_v45 = vpop.f32.mrb[0].mxu1 }
 0x233   :  { %v233_v46 = vadd.f32 %v403_v45, %v331_v44  ;;  %v227_v47 = vpop.f32.mrb[1].mxu1 }
 0x234   :  { %v228_v48 = vadd.f32 %v331_v44, %v227_v47 }
 0x235   :  { %237 = vst [vmem:[#allocation3 + $0x8] sm:$0xff] %v233_v46  ;;  %240 = vmax.xlane.f32.xlu1 %v233_v46 }
 0x236   :  { %236 = vst [vmem:[#allocation3] sm:$0xff] %v228_v48  ;;  %v266_v60 = vsel %vm264_vm3, %v228_v48, 0.0 }
 0x239   :  { %238 = vmax.xlane.f32.xlu1 %v228_v48 }
 0x24a   :  { %262 = vperm.xlu1 %453, %v36_v49  }
 0x2c2   :  { %v241_v50 = vpop.xlane.xlu1 %240 }
 0x2c3   :  { %v243_v51 = vsub.f32 %v233_v46, %v241_v50 }
 0x2c5   :  { %v246_v52 = vmul.f32 1.442695, %v243_v51 }
 0x2c6   :  { %v239_v53 = vpop.xlane.xlu1 %238 }
 0x2c7   :  { %454 = vpow2.f32 %v246_v52  ;;  %v242_v54 = vsub.f32 %v228_v48, %v239_v53 }
 0x2c9   :  { %v244_v55 = vmul.f32 1.442695, %v242_v54 }
 0x2ca   :  { %v263_v59 = vpop.permute.xlu1 %262 }
 0x2cb   :  { %456 = vpow2.f32 %v244_v55  ;;  %vm265_vm4 = vcmp.eq.s32.totalorder %v263_v59, %v38_v32 }
 0x2cc   :  { %v267_v61 = vsel %vm265_vm4, %v233_v46, 0.0 }
 0x2d1   :  { %v455_v56 = vpop.eup %454 }
 0x2d2   :  { %250 = vadd.xlane.f32.xlu1 %v455_v56 }
 0x2d5   :  { %v457_v57 = vpop.eup %456 }
 0x2d6   :  { %248 = vadd.xlane.f32.xlu0 %v457_v57 }
 0x2da   :  { %268 = vadd.xlane.f32.xlu0 %v266_v60 }
 0x2de   :  { %270 = vadd.xlane.f32.xlu0 %v267_v61 }
 0x35f   :  { %v251_v62 = vpop.xlane.xlu1 %250 }
 0x360   :  { %458 = vlog2.f32 %v251_v62 }
 0x363   :  { %v249_v63 = vpop.xlane.xlu0 %248 }
 0x364   :  { %460 = vlog2.f32 %v249_v63 }
 0x367   :  { %v269_v1 = vpop.xlane.xlu0 %268 }
 0x36a   :  { %v459_v0 = vpop.eup %458 }
 0x36b   :  { %v255_v2 = vmul.f32 0.6931472, %v459_v0  ;;  %v271_v6 = vpop.xlane.xlu0 %270 }
 0x36d   :  { %v257_v3 = vadd.f32 %v255_v2, %v241_v50 }
 0x36e   :  { %v461_v4 = vpop.eup %460 }
 0x36f   :  { %v253_v5 = vmul.f32 0.6931472, %v461_v4  ;;  %v274_v8 = vsub.f32 %v257_v3, %v271_v6 }
 0x371   :  { %v256_v7 = vadd.f32 %v253_v5, %v239_v53  ;;  %v277_v11 = vsel %vm275_vm5, %v274_v8, 0.0 }
 0x373   :  { %v273_v9 = vsub.f32 %v256_v7, %v269_v1 }
 0x375   :  { %v276_v10 = vsel %vm275_vm5, %v273_v9, 0.0 }
 0x376   :  { %v278_v12 = vadd.f32 %v277_v11, %v276_v10 }
 0x378   :  { %279 = vadd.xlane.f32.xlu0 %v278_v12 }
 0x379   :  { %473 = shalt.err (!%p470_p4)
}
 0x37a   :  { %s474_s28 = scalar_lea.hbm %s652_s6, 256 }
 0x37b   :  { %p475_p5 = scmp.ne.s32.totalorder %s652_s6, %s474_s28  ;;  %p478_p6 = scmp.lt.u32.totalorder %s474_s28, %s652_s6 }
 0x37d   :  { %p480_p7 = pnand %p478_p6, %p475_p5 }
 0x37f   :  { %483 = shalt.err (!%p480_p7)
}
 0x380   :  { %s501_s10 = smov 128   ;;  %s502_s11 = smov 8  }
 0x381   :  { %309 = dma.vmem_to_hbm [thread:$0]  %s304_s5, 256, %s652_s6, [#allocation4], %s501_s10, %s501_s10, %s502_s11  }
 0x382   :  { %s484_s18 = scalar_lea.hbm %s653_s7, 16 }
 0x383   :  { %p485_p8 = scmp.ne.s32.totalorder %s653_s7, %s484_s18  ;;  %p488_p9 = scmp.lt.u32.totalorder %s484_s18, %s653_s7 }
 0x385   :  { %p490_p10 = pnand %p488_p9, %p485_p8 }
 0x405   :  { %v280_v13 = vpop.xlane.xlu0 %279 }
 0x406   :  { %v281_v14 = vrot.slane %v280_v13, 4 }
 0x408   :  { %v282_v15 = vadd.f32 %v281_v14, %v280_v13 }
 0x40a   :  { %v283_v16 = vrot.slane %v282_v15, 2 }
 0x40c   :  { %v284_v17 = vadd.f32 %v283_v16, %v282_v15 }
 0x40e   :  { %v285_v18 = vrot.slane %v284_v17, 1 }
 0x410   :  { %v286_v19 = vadd.f32 %v285_v18, %v284_v17 }
 0x412   :  { %444 = vpush %v286_v19 }
 0x443   :  { %s445_s14 = spop %444 }
 0x444   :  { %s295_s15 = smul.f32 0.0625, %s445_s14 }
 0x446   :  { %297 = sst [smem:[#allocation6]] %s295_s15 }
 0x447   :  { %493 = shalt.err (!%p490_p10)
}
 0x448   :  { %s503_s20 = smov [#allocation6]  }
 0x449   :  { %317 = dma.smem_to_hbm %s503_s20, 16, %s653_s7, [#allocation5]  }
 0x44a   :  { %494 = dma.done.wait [#allocation4], 256  }
 0x44b   :  { %495 = vsyncadd [#allocation4], 4294967040 }
 0x44c   :  { %496 = dma.done.wait [#allocation5], 16  }
 0x44d   :  { %497 = vsyncadd [#allocation5], 4294967280 }
 0x44e   :  { %324 = sfence }
 0x44f   :  { %325 = vsyncpa [#allocation4], 1 }
 0x450   :  { %326 = vsyncpa [#allocation5], 1 }

</bundles_post_ra>
